<compile_context>
chip_gen: v6e
topology: v6e:2x2x1
jax: 0.10.0
libtpu: 0.0.40
codegen_flags: <defaults>
</compile_context>

<pallas_src>
import functools

import jax
import jax.numpy as jnp
from jax.experimental import pallas as pl
from jax.experimental.pallas import tpu as pltpu


def _mlp_kernel(xT_ref, w1_ref, b1_ref, w2_ref, b2_ref, oT_ref):
    # x tile is (F, tb) with the batch on the 128-lane axis.  Cast (if any)
    # happens here on the VPU, hidden under the DMA, not as a wrapper pass.
    x = xT_ref[...].astype(w1_ref.dtype)
    # fc1 on the MXU: (H, F) @ (F, tb) -> (H, tb), f32 accumulation.
    h = jnp.dot(w1_ref[...], x, preferred_element_type=jnp.float32)
    # Bias add + ReLU in f32 on the VPU (b1 is an (H, 1) column, lane-broadcast).
    h = jnp.maximum(h + b1_ref[...], 0.0)
    # fc2 in f32: (O, H) @ (H, tb) -> (O, tb).  Keeping h in f32 avoids the
    # extra bf16 rounding flagged in the review; MXU is nowhere near the
    # bottleneck here anyway.
    out = jnp.dot(w2_ref[...].astype(jnp.float32), h,
                  preferred_element_type=jnp.float32)
    # Lane-dense store: last dim of the block is tb (multiple of 128).
    oT_ref[...] = (out + b2_ref[...]).astype(oT_ref.dtype)


def _round_up(x, m):
    return ((x + m - 1) // m) * m


def _choose_batch_tile(batch, hidden, block_b):
    """Pick the lane-tile (multiple of 128) and the number of grid steps."""
    # Cap requested by the caller, rounded to a lane multiple.
    cap = max(128, (block_b // 128) * 128)
    # Keep the (H, tb) f32 hidden activation at <= ~8 MiB so we stay far from
    # the scoped-VMEM default even with temporaries / double buffering.
    vmem_cap = max(128, ((8 << 20) // (4 * hidden)) // 128 * 128)
    cap = min(cap, vmem_cap)

    b128 = _round_up(batch, 128)
    n_tiles = pl.cdiv(b128, cap)
    if b128 >= 2 * 128:
        # Ensure >=2 steps so the "parallel" grid axis can shard across the
        # two TensorCores on v7x (no effect on v5e/v6e).
        n_tiles = max(n_tiles, 2)
    tb = _round_up(pl.cdiv(b128, n_tiles), 128)
    n_steps = pl.cdiv(batch, tb)   # ragged last block handled by Pallas
    return tb, n_steps


@functools.partial(jax.jit, static_argnames=("block_b", "compute_dtype"))
def net_forward(state, w1, b1, w2, b2, *, block_b=8192,
                compute_dtype=jnp.float32):
    """state: (B, F).  PyTorch layout: w1 (H, F), b1 (H,)|(1,H), w2 (O, H),
    b2 (O,)|(1,O).  Returns (B, O), matching Net.forward(state)."""
    B, F = state.shape
    H = w1.shape[0]
    O = w2.shape[0]
    out_dtype = state.dtype

    # Feature-major: one cheap transpose of the (B, F) batch in the wrapper,
    # everything else stays lane-dense inside the kernel.
    xT = state.T                                   # (F, B)
    w1c = w1.astype(compute_dtype)                 # (H, F)
    w2c = w2.astype(compute_dtype)                 # (O, H)
    b1c = jnp.asarray(b1, jnp.float32).reshape(H, 1)
    b2c = jnp.asarray(b2, jnp.float32).reshape(O, 1)

    tb, n_steps = _choose_batch_tile(B, H, block_b)

    # Weights / biases: constant block index -> VMEM-resident across the grid.
    resident = lambda shape: pl.BlockSpec(shape, lambda i: (0, 0))

    outT = pl.pallas_call(
        _mlp_kernel,
        out_shape=jax.ShapeDtypeStruct((O, B), out_dtype),
        grid_spec=pl.GridSpec(
            grid=(n_steps,),
            in_specs=[
                pl.BlockSpec((F, tb), lambda i: (0, i)),   # batch tile (pipelined)
                resident((H, F)),
                resident((H, 1)),
                resident((O, H)),
                resident((O, 1)),
            ],
            out_specs=pl.BlockSpec((O, tb), lambda i: (0, i)),
        ),
        compiler_params=pltpu.CompilerParams(
            # Batch tiles are independent -> megacore sharding on v7x.
            dimension_semantics=("parallel",),
        ),
    )(xT, w1c, b1c, w2c, b2c)

    return outT.T                                   # (B, O)


def init_params(key, input_feature, output_feature, hidden_feature=128):
    """Mirrors the PyTorch module (PyTorch (out, in) weight layout):
    weights ~ Normal(0, 0.1); biases keep the default nn.Linear init
    U(-1/sqrt(fan_in), 1/sqrt(fan_in))."""
    k1, k2, k3, k4 = jax.random.split(key, 4)
    w1 = 0.1 * jax.random.normal(k1, (hidden_feature, input_feature), jnp.float32)
    w2 = 0.1 * jax.random.normal(k2, (output_feature, hidden_feature), jnp.float32)
    bound1 = 1.0 / jnp.sqrt(jnp.float32(input_feature))
    bound2 = 1.0 / jnp.sqrt(jnp.float32(hidden_feature))
    b1 = jax.random.uniform(k3, (hidden_feature,), jnp.float32, -bound1, bound1)
    b2 = jax.random.uniform(k4, (output_feature,), jnp.float32, -bound2, bound2)
    return w1, b1, w2, b2


def _reference(state, w1, b1, w2, b2):
    return jnp.maximum(state @ w1.T + b1, 0.0) @ w2.T + b2


if __name__ == "__main__":
    key = jax.random.PRNGKey(0)
    k_params, k_s1, k_s2, k_s3 = jax.random.split(key, 4)

    input_feature = 4      # CartPole-like observation size
    output_feature = 2     # action values
    hidden_feature = 128

    w1, b1, w2, b2 = init_params(k_params, input_feature, output_feature,
                                 hidden_feature)

    # (1) Tiny batch (B=2): single grid step, ragged lanes (2 of 128 valid).
    state_small = jax.random.normal(k_s1, (2, input_feature), jnp.float32)
    out_small = jax.block_until_ready(net_forward(state_small, w1, b1, w2, b2))
    ref_small = _reference(state_small, w1, b1, w2, b2)
    assert out_small.shape == (2, output_feature)
    assert jnp.allclose(out_small, ref_small, atol=1e-4, rtol=1e-4)

    # (2) Ragged multi-step grid: B=300 with tb=128 -> grid=(3,), last tile
    #     has 44 valid lanes (exercises the masked last block, no padding).
    state_mid = jax.random.normal(k_s2, (300, input_feature), jnp.float32)
    out_mid = jax.block_until_ready(
        net_forward(state_mid, w1, b1, w2, b2, block_b=128))
    ref_mid = _reference(state_mid, w1, b1, w2, b2)
    assert out_mid.shape == (300, output_feature)
    assert jnp.allclose(out_mid, ref_mid, atol=1e-4, rtol=1e-4)

    # (3) Default tiling with a larger batch: B=1024 -> 2 tiles of 512 lanes
    #     (>=2 steps so the "parallel" axis engages both TCs on v7x).
    state_big = jax.random.normal(k_s3, (1024, input_feature), jnp.float32)
    out_big = jax.block_until_ready(net_forward(state_big, w1, b1, w2, b2))
    ref_big = _reference(state_big, w1, b1, w2, b2)
    assert out_big.shape == (1024, output_feature)
    assert jnp.allclose(out_big, ref_big, atol=1e-4, rtol=1e-4)

    print("KERNEL_OK")
</pallas_src>

<mosaic_0001>
module attributes {stable_mosaic.version = 11 : i64} {
  func.func @_mlp_kernel(%arg0: i32, %arg1: memref<4x128xf32, #tpu.memory_space<vmem>>, %arg2: memref<128x4xf32, #tpu.memory_space<vmem>>, %arg3: memref<128x1xf32, #tpu.memory_space<vmem>>, %arg4: memref<2x128xf32, #tpu.memory_space<vmem>>, %arg5: memref<2x1xf32, #tpu.memory_space<vmem>>, %arg6: memref<2x128xf32, #tpu.memory_space<vmem>>) attributes {dimension_semantics = [#tpu.dimension_semantics<parallel>], iteration_bounds = array<i64: 1>, scalar_prefetch = 0 : i64, scratch_operands = 0 : i64, tpu.core_type = #tpu.core_type<tc>, window_params = [{transform_indices = @transform_0, window_bounds = array<i64: 4, 128>}, {pipeline_mode = #tpu.pipeline_mode<synchronous>, transform_indices = @transform_1, window_bounds = array<i64: 128, 4>}, {pipeline_mode = #tpu.pipeline_mode<synchronous>, transform_indices = @transform_2, window_bounds = array<i64: 128, 1>}, {pipeline_mode = #tpu.pipeline_mode<synchronous>, transform_indices = @transform_3, window_bounds = array<i64: 2, 128>}, {pipeline_mode = #tpu.pipeline_mode<synchronous>, transform_indices = @transform_4, window_bounds = array<i64: 2, 1>}, {transform_indices = @transform_5, window_bounds = array<i64: 2, 128>}]} {
    %c0 = arith.constant 0 : index
    %c0_0 = arith.constant 0 : index
    %0 = vector.load %arg1[%c0, %c0_0] : memref<4x128xf32, #tpu.memory_space<vmem>>, vector<4x128xf32>
    %c0_1 = arith.constant 0 : index
    %c0_2 = arith.constant 0 : index
    %1 = vector.load %arg2[%c0_1, %c0_2] : memref<128x4xf32, #tpu.memory_space<vmem>>, vector<128x4xf32>
    %cst = arith.constant dense<0.000000e+00> : vector<128x128xf32>
    %2 = tpu.matmul %1, %0, %cst {dimension_numbers = #tpu.dot_dimension_numbers<[1], [0], [0], [1], [0, 0, 1, 1], [], []>} : vector<128x4xf32>, vector<4x128xf32>, vector<128x128xf32> -> vector<128x128xf32>
    %c0_3 = arith.constant 0 : index
    %c0_4 = arith.constant 0 : index
    %3 = vector.load %arg3[%c0_3, %c0_4] : memref<128x1xf32, #tpu.memory_space<vmem>>, vector<128x1xf32>
    %4 = vector.broadcast %3 : vector<128x1xf32> to vector<128x128xf32>
    %5 = arith.addf %2, %4 : vector<128x128xf32>
    %cst_5 = arith.constant 0.000000e+00 : f32
    %6 = vector.broadcast %cst_5 : f32 to vector<128x128xf32>
    %7 = arith.maximumf %5, %6 : vector<128x128xf32>
    %c0_6 = arith.constant 0 : index
    %c0_7 = arith.constant 0 : index
    %8 = vector.load %arg4[%c0_6, %c0_7] : memref<2x128xf32, #tpu.memory_space<vmem>>, vector<2x128xf32>
    %cst_8 = arith.constant dense<0.000000e+00> : vector<2x128xf32>
    %9 = tpu.matmul %8, %7, %cst_8 {dimension_numbers = #tpu.dot_dimension_numbers<[1], [0], [0], [1], [0, 0, 1, 1], [], []>} : vector<2x128xf32>, vector<128x128xf32>, vector<2x128xf32> -> vector<2x128xf32>
    %c0_9 = arith.constant 0 : index
    %c0_10 = arith.constant 0 : index
    %10 = vector.load %arg5[%c0_9, %c0_10] : memref<2x1xf32, #tpu.memory_space<vmem>>, vector<2x1xf32>
    %11 = vector.broadcast %10 : vector<2x1xf32> to vector<2x128xf32>
    %12 = arith.addf %9, %11 : vector<2x128xf32>
    %c0_11 = arith.constant 0 : index
    %c0_12 = arith.constant 0 : index
    %13 = vector.load %arg6[%c0_11, %c0_12] : memref<2x128xf32, #tpu.memory_space<vmem>>, vector<2x128xf32>
    tpu.vector_store %arg6[%c0_11, %c0_12], %12 {strides = array<i32>} : memref<2x128xf32, #tpu.memory_space<vmem>>, vector<2x128xf32>,
    return
  }
  func.func @transform_0(%arg0: i32) -> (i32, i32) {
    %c0_i32 = arith.constant 0 : i32
    %c0_i32_0 = arith.constant 0 : i32
    return %c0_i32, %arg0 : i32, i32
  }
  func.func @transform_1(%arg0: i32) -> (i32, i32) {
    %c0_i32 = arith.constant 0 : i32
    %c0_i32_0 = arith.constant 0 : i32
    %c0_i32_1 = arith.constant 0 : i32
    return %c0_i32, %c0_i32_0 : i32, i32
  }
  func.func @transform_2(%arg0: i32) -> (i32, i32) {
    %c0_i32 = arith.constant 0 : i32
    %c0_i32_0 = arith.constant 0 : i32
    %c0_i32_1 = arith.constant 0 : i32
    return %c0_i32, %c0_i32_0 : i32, i32
  }
  func.func @transform_3(%arg0: i32) -> (i32, i32) {
    %c0_i32 = arith.constant 0 : i32
    %c0_i32_0 = arith.constant 0 : i32
    %c0_i32_1 = arith.constant 0 : i32
    return %c0_i32, %c0_i32_0 : i32, i32
  }
  func.func @transform_4(%arg0: i32) -> (i32, i32) {
    %c0_i32 = arith.constant 0 : i32
    %c0_i32_0 = arith.constant 0 : i32
    %c0_i32_1 = arith.constant 0 : i32
    return %c0_i32, %c0_i32_0 : i32, i32
  }
  func.func @transform_5(%arg0: i32) -> (i32, i32) {
    %c0_i32 = arith.constant 0 : i32
    %c0_i32_0 = arith.constant 0 : i32
    return %c0_i32, %arg0 : i32, i32
  }
}

</mosaic_0001>

<bundles_post_ra>
// kernel: net_forward.1
= control target key start
LH: loop header
LB: loop body
LE: loop exit
PB: predicated region body
PF: predicated region fallthrough
CT: control target
= control target key end

     0   :  { %vm182_vm0 = vcmask 1043456   ;;  %vm133_vm1 = vcmask 31744   ;;  %v546_v3 = vmov 0   ;;  %v547_v35 = vmov 0.0   ;;  %s732_s0 = inlined_call_operand.vmem [shape: f32[4,2], index: 0, kind: input, shape index: {}]   ;;  %s733_s1 = inlined_call_operand.vmem [shape: f32[128,4], index: 1, kind: input, shape index: {}]   ;;  %s734_s2 = inlined_call_operand.vmem [shape: f32[128,1], index: 2, kind: input, shape index: {}]   ;;  %s735_s4 = inlined_call_operand.vmem [shape: f32[2,1], index: 4, kind: input, shape index: {}]   ;;  %s736_s3 = inlined_call_operand.vmem [shape: f32[2,128], index: 3, kind: input, shape index: {}]   ;;  %s737_s5 = inlined_call_operand.vmem [shape: f32[2,2], index: 5, kind: output, shape index: {}]  }
   0x1   :  { %v20_v0 = vld [vmem:[%s732_s0] sm:$0xf]  ;;  %v22_v2 = vld [vmem:[%s733_s1 + $0x8] sm:$0xff]  ;;  %544 = vset.pattern.permute.xlu0 %v546_v3  ;;  %545 = vset.pattern.permute.xlu1 %v546_v3  ;;  %v23_v4 = vld [vmem:[%s733_s1 + $0x10] sm:$0xff]  ;;  %vm548_vm2 = vmmov 0  }
   0x2   :  { %v21_v1 = vld [vmem:[%s733_s1] sm:$0xff]  ;;  %480 = vmatprep.subr.msk.mxu0 %vm182_vm0, %v20_v0  ;;  %v24_v5 = vld [vmem:[%s733_s1 + $0x18] sm:$0xff]  ;;  %v50_v8 = vld [vmem:[%s734_s2 + $0x68] sm:$0xff]  ;;  %506 = vmatprep.subr.mxu1 %v547_v35 }
   0x3   :  { %482 = vmatprep.mubr.msk.f32.mxu0 %vm133_vm1, %v21_v1  ;;  %481 = vmatpush3.msk.msra.mxu0 %vm182_vm0, %v20_v0  ;;  %v25_v6 = vld [vmem:[%s733_s1 + $0x20] sm:$0xff]  ;;  %v52_v7 = vld [vmem:[%s734_s2 + $0x78] sm:$0xff]  ;;  %v51_v9 = vld [vmem:[%s734_s2 + $0x70] sm:$0xff] }
   0x4   :  { %483 = vmatmul.mubr.msk.f32.vlgmr.msra.gmra.mxu0 %vm133_vm1, %v22_v2  ;;  %130 = vperm.xlu0 %544, %v52_v7   ;;  %v26_v10 = vld [vmem:[%s733_s1 + $0x28] sm:$0xff]  ;;  %v49_v11 = vld [vmem:[%s734_s2 + $0x60] sm:$0xff]  ;;  %v27_v12 = vld [vmem:[%s733_s1 + $0x30] sm:$0xff] }
   0x5   :  { %485 = vmatprep.mubr.msk.f32.mxu0 %vm133_vm1, %v23_v4  ;;  %120 = vperm.xlu1 %545, %v50_v8   ;;  %v48_v13 = vld [vmem:[%s734_s2 + $0x58] sm:$0xff]  ;;  %v47_v15 = vld [vmem:[%s734_s2 + $0x50] sm:$0xff]  ;;  %v29_v16 = vld [vmem:[%s733_s1 + $0x40] sm:$0xff] }
   0x6   :  { %v28_v14 = vld [vmem:[%s733_s1 + $0x38] sm:$0xff]  ;;  %v46_v17 = vld [vmem:[%s734_s2 + $0x48] sm:$0xff]  ;;  %v45_v19 = vld [vmem:[%s734_s2 + $0x40] sm:$0xff]  ;;  %538 = vmatprep.mubr.msk.f32.mxu1 %vm548_vm2, %v547_v35 }
   0x7   :  { %v30_v18 = vld [vmem:[%s733_s1 + $0x48] sm:$0xff]  ;;  %v31_v20 = vld [vmem:[%s733_s1 + $0x50] sm:$0xff]  ;;  %v44_v21 = vld [vmem:[%s734_s2 + $0x38] sm:$0xff] }
   0x8   :  { %486 = vmatmul.mubr.msk.f32.gmra.mxu0 %vm133_vm1, %v24_v5  ;;  %125 = vperm.xlu0 %544, %v51_v9   ;;  %v32_v22 = vld [vmem:[%s733_s1 + $0x58] sm:$0xff]  ;;  %v43_v23 = vld [vmem:[%s734_s2 + $0x30] sm:$0xff]  ;;  %v33_v24 = vld [vmem:[%s733_s1 + $0x60] sm:$0xff] }
   0x9   :  { %488 = vmatprep.mubr.msk.f32.mxu0 %vm133_vm1, %v25_v6  ;;  %115 = vperm.xlu1 %545, %v49_v11   ;;  %v42_v25 = vld [vmem:[%s734_s2 + $0x28] sm:$0xff]  ;;  %v41_v27 = vld [vmem:[%s734_s2 + $0x20] sm:$0xff]  ;;  %v35_v28 = vld [vmem:[%s733_s1 + $0x70] sm:$0xff] }
   0xa   :  { %v34_v26 = vld [vmem:[%s733_s1 + $0x68] sm:$0xff]  ;;  %v40_v29 = vld [vmem:[%s734_s2 + $0x18] sm:$0xff]  ;;  %v39_v31 = vld [vmem:[%s734_s2 + $0x10] sm:$0xff] }
   0xb   :  { %v36_v30 = vld [vmem:[%s733_s1 + $0x78] sm:$0xff]  ;;  %v38_v32 = vld [vmem:[%s734_s2 + $0x8] sm:$0xff]  ;;  %v37_v33 = vld [vmem:[%s734_s2] sm:$0xff] }
   0xc   :  { %489 = vmatmul.mubr.msk.f32.gmra.mxu0 %vm133_vm1, %v26_v10  ;;  %110 = vperm.xlu0 %544, %v48_v13   ;;  %v348_v34 = vld [vmem:[%s735_s4] sm:$0x3] }
   0xd   :  { %491 = vmatprep.mubr.msk.f32.mxu0 %vm133_vm1, %v27_v12  ;;  %105 = vperm.xlu1 %545, %v47_v15  }
  0x10   :  { %492 = vmatmul.mubr.msk.f32.gmra.mxu0 %vm133_vm1, %v28_v14  ;;  %100 = vperm.xlu0 %544, %v46_v17  }
  0x11   :  { %494 = vmatprep.mubr.msk.f32.mxu0 %vm133_vm1, %v29_v16  ;;  %95 = vperm.xlu1 %545, %v45_v19  }
  0x14   :  { %495 = vmatmul.mubr.msk.f32.gmra.mxu0 %vm133_vm1, %v30_v18  ;;  %90 = vperm.xlu0 %544, %v44_v21  }
  0x15   :  { %497 = vmatprep.mubr.msk.f32.mxu0 %vm133_vm1, %v31_v20  ;;  %85 = vperm.xlu1 %545, %v43_v23  }
  0x18   :  { %498 = vmatmul.mubr.msk.f32.gmra.mxu0 %vm133_vm1, %v32_v22  ;;  %80 = vperm.xlu0 %544, %v42_v25  }
  0x19   :  { %500 = vmatprep.mubr.msk.f32.mxu0 %vm133_vm1, %v33_v24  ;;  %75 = vperm.xlu1 %545, %v41_v27  }
  0x1c   :  { %501 = vmatmul.mubr.msk.f32.gmra.mxu0 %vm133_vm1, %v34_v26  ;;  %70 = vperm.xlu0 %544, %v40_v29  }
  0x1d   :  { %503 = vmatprep.mubr.msk.f32.mxu0 %vm133_vm1, %v35_v28  ;;  %65 = vperm.xlu1 %545, %v39_v31  }
  0x20   :  { %504 = vmatmul.mubr.msk.f32.gmra.mxu0 %vm133_vm1, %v36_v30  ;;  %60 = vperm.xlu0 %544, %v38_v32  }
  0x21   :  { %55 = vperm.xlu1 %545, %v37_v33  }
  0x24   :  { %351 = vperm.xlu0 %544, %v348_v34  }
  0x7f   :  { %v131_v41 = vpop.permute.xlu0 %130 }
  0x80   :  { %v121_v43 = vpop.permute.xlu1 %120 }
  0x83   :  { %v126_v46 = vpop.permute.xlu0 %125 }
  0x84   :  { %v116_v48 = vpop.permute.xlu1 %115 }
  0x87   :  { %v111_v51 = vpop.permute.xlu0 %110 }
  0x88   :  { %v106_v53 = vpop.permute.xlu1 %105 }
  0x8b   :  { %v101_v56 = vpop.permute.xlu0 %100 }
  0x8c   :  { %v96_v59 = vpop.permute.xlu1 %95 }
  0x8f   :  { %v91_v2 = vpop.permute.xlu0 %90 }
  0x90   :  { %v86_v5 = vpop.permute.xlu1 %85 }
  0x93   :  { %v81_v10 = vpop.permute.xlu0 %80 }
  0x94   :  { %v76_v13 = vpop.permute.xlu1 %75 }
  0x97   :  { %v71_v18 = vpop.permute.xlu0 %70 }
  0x98   :  { %v66_v21 = vpop.permute.xlu1 %65 }
  0x9b   :  { %v61_v26 = vpop.permute.xlu0 %60 }
  0x9c   :  { %v56_v29 = vpop.permute.xlu1 %55 }
  0xc4   :  { %v699_v36 = vpop.f32.mrf.mxu0 }
  0xc5   :  { %v258_v30 = vadd.f32 %v699_v36, %v61_v26  ;;  %v347_v36 = vld [vmem:[%s736_s3] sm:$0x3] }
  0xc6   :  { %v701_v37 = vpop.f32.mrf.mxu0 }
  0xc7   :  { %v253_v32 = vadd.f32 %v701_v37, %v56_v29  ;;  %v332_v34 = vmax.f32 %v258_v30, 0.0 }
  0xc8   :  { %v703_v38 = vpop.f32.mrf.mxu0 }
  0xc9   :  { %v268_v24 = vadd.f32 %v703_v38, %v71_v18  ;;  %v331_v38 = vmax.f32 %v253_v32, 0.0 }
  0xca   :  { %v705_v39 = vpop.f32.mrf.mxu0 }
  0xcb   :  { %v263_v27 = vadd.f32 %v705_v39, %v66_v21  ;;  %v334_v31 = vmax.f32 %v268_v24, 0.0  ;;  %v352_v39 = vpop.permute.xlu0 %351 }
  0xcc   :  { %v490_v40 = vpop.f32.mrf.mxu0 }
  0xcd   :  { %v278_v19 = vadd.f32 %v490_v40, %v81_v10  ;;  %v333_v33 = vmax.f32 %v263_v27, 0.0 }
  0xce   :  { %v272_v42 = vpop.f32.mrf.mxu0 }
  0xcf   :  { %v273_v22 = vadd.f32 %v272_v42, %v76_v13  ;;  %v336_v25 = vmax.f32 %v278_v19, 0.0 }
  0xd0   :  { %v493_v44 = vpop.f32.mrf.mxu0 }
  0xd1   :  { %v288_v14 = vadd.f32 %v493_v44, %v91_v2  ;;  %v335_v28 = vmax.f32 %v273_v22, 0.0 }
  0xd2   :  { %v282_v45 = vpop.f32.mrf.mxu0 }
  0xd3   :  { %v283_v16 = vadd.f32 %v282_v45, %v86_v5  ;;  %v338_v20 = vmax.f32 %v288_v14, 0.0 }
  0xd4   :  { %v496_v47 = vpop.f32.mrf.mxu0 }
  0xd5   :  { %v298_v8 = vadd.f32 %v496_v47, %v101_v56  ;;  %v337_v23 = vmax.f32 %v283_v16, 0.0 }
  0xd6   :  { %v292_v49 = vpop.f32.mrf.mxu0 }
  0xd7   :  { %v293_v11 = vadd.f32 %v292_v49, %v96_v59  ;;  %v340_v15 = vmax.f32 %v298_v8, 0.0 }
  0xd8   :  { %v499_v50 = vpop.f32.mrf.mxu0 }
  0xd9   :  { %v308_v3 = vadd.f32 %v499_v50, %v111_v51  ;;  %v339_v17 = vmax.f32 %v293_v11, 0.0 }
  0xda   :  { %v302_v52 = vpop.f32.mrf.mxu0 }
  0xdb   :  { %v303_v6 = vadd.f32 %v302_v52, %v106_v53  ;;  %v342_v9 = vmax.f32 %v308_v3, 0.0 }
  0xdc   :  { %v502_v54 = vpop.f32.mrf.mxu0 }
  0xdd   :  { %v318_v61 = vadd.f32 %v502_v54, %v121_v43  ;;  %v341_v12 = vmax.f32 %v303_v6, 0.0 }
  0xde   :  { %v312_v55 = vpop.f32.mrf.mxu0 }
  0xdf   :  { %v313_v0 = vadd.f32 %v312_v55, %v116_v48  ;;  %v344_v4 = vmax.f32 %v318_v61, 0.0 }
  0xe0   :  { %v505_v57 = vpop.f32.mrf.mxu0 }
  0xe1   :  { %v328_v58 = vadd.f32 %v505_v57, %v131_v41  ;;  %v343_v7 = vmax.f32 %v313_v0, 0.0 }
  0xe2   :  { %v322_v60 = vpop.f32.mrf.mxu0 }
  0xe3   :  { %v346_v62 = vmax.f32 %v328_v58, 0.0  ;;  %v323_v63 = vadd.f32 %v322_v60, %v126_v46 }
  0xe5   :  { %v345_v1 = vmax.f32 %v323_v63, 0.0  ;;  %507 = vmatpush3.msra.mxu1 %v346_v62 }
  0xe6   :  { %508 = vmatprep.subr.mxu1 %v547_v35 }
  0xe7   :  { %509 = vmatpush3.msra.mxu1 %v345_v1 }
  0xe8   :  { %510 = vmatprep.subr.mxu1 %v547_v35 }
  0xe9   :  { %511 = vmatpush3.msra.mxu1 %v344_v4 }
  0xea   :  { %512 = vmatprep.subr.mxu1 %v547_v35 }
  0xeb   :  { %513 = vmatpush3.msra.mxu1 %v343_v7 }
  0xec   :  { %514 = vmatprep.subr.mxu1 %v547_v35 }
  0xed   :  { %515 = vmatpush3.msra.mxu1 %v342_v9 }
  0xee   :  { %516 = vmatprep.subr.mxu1 %v547_v35 }
  0xef   :  { %517 = vmatpush3.msra.mxu1 %v341_v12 }
  0xf0   :  { %518 = vmatprep.subr.mxu1 %v547_v35 }
  0xf1   :  { %519 = vmatpush3.msra.mxu1 %v340_v15 }
  0xf2   :  { %520 = vmatprep.subr.mxu1 %v547_v35 }
  0xf3   :  { %521 = vmatpush3.msra.mxu1 %v339_v17 }
  0xf4   :  { %522 = vmatprep.subr.mxu1 %v547_v35 }
  0xf5   :  { %523 = vmatpush3.msra.mxu1 %v338_v20 }
  0xf6   :  { %524 = vmatprep.subr.mxu1 %v547_v35 }
  0xf7   :  { %525 = vmatpush3.msra.mxu1 %v337_v23 }
  0xf8   :  { %526 = vmatprep.subr.mxu1 %v547_v35 }
  0xf9   :  { %527 = vmatpush3.msra.mxu1 %v336_v25 }
  0xfa   :  { %528 = vmatprep.subr.mxu1 %v547_v35 }
  0xfb   :  { %529 = vmatpush3.msra.mxu1 %v335_v28 }
  0xfc   :  { %530 = vmatprep.subr.mxu1 %v547_v35 }
  0xfd   :  { %531 = vmatpush3.msra.mxu1 %v334_v31 }
  0xfe   :  { %532 = vmatprep.subr.mxu1 %v547_v35 }
  0xff   :  { %533 = vmatpush3.msra.mxu1 %v333_v33 }
 0x100   :  { %534 = vmatprep.subr.mxu1 %v547_v35 }
 0x101   :  { %535 = vmatpush3.msra.mxu1 %v332_v34 }
 0x102   :  { %536 = vmatprep.subr.mxu1 %v547_v35 }
 0x103   :  { %537 = vmatpush3.msra.mxu1 %v331_v38 }
 0x104   :  { %539 = vmatmul.mubr.f32.vlgmr.msra.gmra.mxu1 %v347_v36 }
 0x1c4   :  { %v420_v37 = vpop.f32.mrf.mxu1 }
 0x1c5   :  { %v421_v40 = vadd.f32 %v420_v37, %v352_v39 }
 0x1c6   :  { %v540_v41 = vpop.f32.mrf.mxu1 }
 0x1c7   :  { %424 = vst [vmem:[%s737_s5] sm:$0x3] %v421_v40 }

</bundles_post_ra>
